<compile_context>
chip_gen: v7x
topology: tpu7x:2x2x1
jax: 0.10.0
libtpu: 0.0.40
codegen_flags: <defaults>
</compile_context>

<pallas_src>
import jax
import jax.numpy as jnp
from jax.experimental import pallas as pl
from jax.experimental.pallas import tpu as pltpu


def _vmem_budget():
    """Returns (bytes usable for double-buffered blocks, vmem_limit_bytes|None)."""
    try:
        kind = jax.devices()[0].device_kind.lower()
    except Exception:
        kind = ""
    if "v7" in kind:
        # v7x: 64 MiB physical VMEM / 32 MiB scoped default.
        return 24 << 20, 32 << 20
    if any(v in kind for v in ("v4", "v5", "v6")):
        # 128 MiB physical VMEM: raise the scoped limit and use big tiles.
        return 48 << 20, 64 << 20
    # Unknown / older generation: stay safely under the default scoped limit.
    return 8 << 20, None


def _row_tile(R, cap, sub):
    """Pick a row tile: full R if it fits, else the largest sublane-aligned cap."""
    cap = max(sub, (cap // sub) * sub)
    if R <= cap:
        return R, 1, False          # single block equal to the full row extent
    return cap, pl.cdiv(R, cap), (R % cap != 0)


# ---------------- fused single-pass kernel (per-batch slab fits VMEM) ---------

def _fused_kernel(x_ref, wbig_ref, bbig_ref, o_ref):
    x32 = x_ref[0].astype(jnp.float32)                        # (R, LANE)
    s = jnp.sum(x32, axis=0, keepdims=True)                   # (1, LANE)
    lin = jnp.dot(s, wbig_ref[...],
                  preferred_element_type=jnp.float32) + bbig_ref[...]
    attn = jax.nn.sigmoid(lin)                                 # (1, LANE)
    o_ref[0] = (x32 * attn).astype(o_ref.dtype)


# ---------------- two-stage path ----------------------------------------------

def _make_attn_kernel(tile_r, R, ragged):
    """Stage 1: per-batch column sums -> mean + Linear + sigmoid (lane-tiled)."""
    grouped = (tile_r % 8 == 0)

    def kernel(x_ref, wbig_ref, bbig_ref, attn_ref, acc_ref):
        r = pl.program_id(1)

        @pl.when(r == 0)
        def _init():
            acc_ref[...] = jnp.zeros_like(acc_ref)

        x = x_ref[0].astype(jnp.float32)                       # (tile_r, LANE)
        if ragged:
            rem = R - r * tile_r                               # rows still in bounds
            valid = jax.lax.broadcasted_iota(jnp.int32, x.shape, 0) < rem
            x = jnp.where(valid, x, 0.0)

        if grouped:
            # VPU-only partial sums into 8 sublane accumulators; the single
            # cross-sublane (XLU) collapse is deferred to the finalize step.
            acc_ref[...] += jnp.sum(x.reshape(tile_r // 8, 8, x.shape[-1]), axis=0)
        else:
            # Only reachable when tile_r == R (single reduction step).
            acc_ref[0:1, :] += jnp.sum(x, axis=0, keepdims=True)

        @pl.when(r == pl.num_programs(1) - 1)
        def _finalize():
            s = jnp.sum(acc_ref[...], axis=0, keepdims=True)   # (1, LANE)
            lin = jnp.dot(s, wbig_ref[...],
                          preferred_element_type=jnp.float32) + bbig_ref[...]
            attn_ref[0] = jax.nn.sigmoid(lin)

    return kernel


def _scale_kernel(attn_ref, x_ref, o_ref):
    """Stage 2: lane-dense elementwise scale (HBM-roofline read/scale/write)."""
    o_ref[...] = (x_ref[...] * attn_ref[...]).astype(o_ref.dtype)


# ---------------- wrapper -------------------------------------------------------

def freq_attn(x, weight, bias, *, max_reduce_rows=None, max_scale_rows=None,
              force_two_stage=False):
    """x: (B, C, T, F); weight: (F, F) PyTorch Linear weight (out, in); bias: (F,)."""
    B, C, T, F = x.shape
    CT = C * T

    # Lane-dense packing: P consecutive F-vectors per LANE-wide row.
    if F % 128 == 0:
        P, LANE = 1, F
    elif 128 % F == 0 and CT % (128 // F) == 0:
        P, LANE = 128 // F, 128
    else:
        # TODO(synk): pad C*T (or F) to a packable multiple instead of bailing out.
        raise NotImplementedError(
            "freq_attn requires F | 128 (or 128 | F) and (C*T) % (128//F) == 0")

    R = (CT * F) // LANE                        # packed rows per batch
    itemsize = jnp.dtype(x.dtype).itemsize
    sub = max(8, 32 // itemsize)                # 8/16/32 sublanes for f32/bf16/int8

    xp = x.reshape(B, R, LANE)

    # Fold W^T, the 1/CT mean and the pack replication into host-side constants.
    wt = jnp.asarray(weight, jnp.float32).T / CT                            # (F, F)
    wbig = jnp.tile(wt, (P, P))                                             # (LANE, LANE)
    bbig = jnp.tile(jnp.asarray(bias, jnp.float32).reshape(1, F), (1, P))   # (1, LANE)

    budget, vmem_limit = _vmem_budget()

    # ---- fused single-pass path: 1 read + 1 write of x --------------------------
    slab = R * LANE * itemsize
    fused_bytes = 4 * slab + 2 * LANE * LANE * 4 + 2 * LANE * 4
    if (not force_two_stage) and fused_bytes <= budget:
        out = pl.pallas_call(
            _fused_kernel,
            out_shape=jax.ShapeDtypeStruct((B, R, LANE), x.dtype),
            grid_spec=pltpu.PrefetchScalarGridSpec(
                num_scalar_prefetch=0,
                grid=(B,),
                in_specs=[
                    pl.BlockSpec((1, R, LANE), lambda b: (b, 0, 0)),
                    pl.BlockSpec((LANE, LANE), lambda b: (0, 0)),
                    pl.BlockSpec((1, LANE), lambda b: (0, 0)),
                ],
                out_specs=pl.BlockSpec((1, R, LANE), lambda b: (b, 0, 0)),
            ),
            compiler_params=pltpu.CompilerParams(
                dimension_semantics=("parallel",),
                vmem_limit_bytes=vmem_limit),
        )(xp, wbig, bbig)
        return out.reshape(B, C, T, F)

    # ---- two-stage path ----------------------------------------------------------
    # Stage 1 double-buffers only one input block; stage 2 double-buffers an
    # input + an output block: size the row tiles independently from the budget.
    cap1 = min(budget // (2 * LANE * itemsize), 16384)
    cap2 = min(budget // (4 * LANE * itemsize), 8192)
    if max_reduce_rows is not None:
        cap1 = min(cap1, max_reduce_rows)
    if max_scale_rows is not None:
        cap2 = min(cap2, max_scale_rows)
    tile_r1, n_r1, ragged1 = _row_tile(R, cap1, sub)
    tile_r2, n_r2, _ = _row_tile(R, cap2, sub)

    # TODO(synk): on v7x with B == 1 (or odd B) add a size-2 "parallel" split of
    # the reduction rows so stage 1 keeps both TensorCores busy.

    attn = pl.pallas_call(
        _make_attn_kernel(tile_r1, R, ragged1),
        out_shape=jax.ShapeDtypeStruct((B, 1, LANE), jnp.float32),
        grid_spec=pltpu.PrefetchScalarGridSpec(
            num_scalar_prefetch=0,
            grid=(B, n_r1),
            in_specs=[
                pl.BlockSpec((1, tile_r1, LANE), lambda b, r: (b, r, 0)),
                pl.BlockSpec((LANE, LANE), lambda b, r: (0, 0)),
                pl.BlockSpec((1, LANE), lambda b, r: (0, 0)),
            ],
            out_specs=pl.BlockSpec((1, 1, LANE), lambda b, r: (b, 0, 0)),
            scratch_shapes=[pltpu.VMEM((8, LANE), jnp.float32)],
        ),
        compiler_params=pltpu.CompilerParams(
            dimension_semantics=("parallel", "arbitrary"),
            vmem_limit_bytes=vmem_limit),
    )(xp, wbig, bbig)

    out = pl.pallas_call(
        _scale_kernel,
        out_shape=jax.ShapeDtypeStruct((B, R, LANE), x.dtype),
        grid_spec=pltpu.PrefetchScalarGridSpec(
            num_scalar_prefetch=0,
            grid=(B, n_r2),
            in_specs=[
                pl.BlockSpec((1, 1, LANE), lambda b, r: (b, 0, 0)),
                pl.BlockSpec((1, tile_r2, LANE), lambda b, r: (b, r, 0)),
            ],
            out_specs=pl.BlockSpec((1, tile_r2, LANE), lambda b, r: (b, r, 0)),
        ),
        compiler_params=pltpu.CompilerParams(
            dimension_semantics=("parallel", "parallel"),
            vmem_limit_bytes=vmem_limit),
    )(attn, xp)

    return out.reshape(B, C, T, F)


def freq_attn_ref(x, weight, bias):
    """Pure-JAX reference matching the PyTorch forward."""
    lin = jnp.einsum("bctf,of->bcto", x, weight) + bias
    attn = jax.nn.sigmoid(lin.mean(axis=1).mean(axis=1))[:, None, None, :]
    return x * attn


if __name__ == "__main__":
    key = jax.random.PRNGKey(0)
    F = 16  # freq_num

    kx, kw, kb, kx2 = jax.random.split(key, 4)
    # Deterministic Linear(freq_num, freq_num) init (PyTorch-style uniform bound)
    bound = 1.0 / (F ** 0.5)
    weight = jax.random.uniform(kw, (F, F), jnp.float32, -bound, bound)
    bias = jax.random.uniform(kb, (F,), jnp.float32, -bound, bound)

    # Path 1: fused single-pass kernel (per-batch slab fits VMEM).
    x = jax.random.normal(kx, (2, 4, 16, F), dtype=jnp.float32)
    out = jax.block_until_ready(freq_attn(x, weight, bias))
    ref = freq_attn_ref(x, weight, bias)
    assert out.shape == x.shape
    assert jnp.allclose(out, ref, atol=1e-5, rtol=1e-5), "fused path mismatch"

    # Path 2: two-stage path with multi-step, ragged reduction (forced tiny tiles
    # so the accumulate / mask / tiled-scale machinery is actually exercised).
    x2 = jax.random.normal(kx2, (2, 4, 36, F), dtype=jnp.float32)  # R = 18 packed rows
    out2 = jax.block_until_ready(
        freq_attn(x2, weight, bias, force_two_stage=True,
                  max_reduce_rows=8, max_scale_rows=8))
    ref2 = freq_attn_ref(x2, weight, bias)
    assert out2.shape == x2.shape
    assert jnp.allclose(out2, ref2, atol=1e-5, rtol=1e-5), "two-stage path mismatch"

    print("KERNEL_OK")
</pallas_src>

<mosaic_0001>
module attributes {stable_mosaic.version = 11 : i64} {
  func.func @_fused_kernel(%arg0: i32, %arg1: memref<1x8x128xf32, #tpu.memory_space<vmem>>, %arg2: memref<128x128xf32, #tpu.memory_space<vmem>>, %arg3: memref<1x128xf32, #tpu.memory_space<vmem>>, %arg4: memref<1x8x128xf32, #tpu.memory_space<vmem>>) attributes {dimension_semantics = [#tpu.dimension_semantics<parallel>], iteration_bounds = array<i64: 2>, scalar_prefetch = 0 : i64, scratch_operands = 0 : i64, tpu.core_type = #tpu.core_type<tc>, window_params = [{transform_indices = @transform_0, window_bounds = array<i64: 1, 8, 128>}, {pipeline_mode = #tpu.pipeline_mode<synchronous>, transform_indices = @transform_1, window_bounds = array<i64: 128, 128>}, {pipeline_mode = #tpu.pipeline_mode<synchronous>, transform_indices = @transform_2, window_bounds = array<i64: 1, 128>}, {transform_indices = @transform_3, window_bounds = array<i64: 1, 8, 128>}]} {
    %c0 = arith.constant 0 : index
    %c0_0 = arith.constant 0 : index
    %c0_1 = arith.constant 0 : index
    %0 = vector.load %arg1[%c0, %c0_0, %c0_1] : memref<1x8x128xf32, #tpu.memory_space<vmem>>, vector<1x8x128xf32>
    %1 = vector.shape_cast %0 : vector<1x8x128xf32> to vector<8x128xf32>
    %cst = arith.constant dense<0.000000e+00> : vector<128xf32>
    %2 = vector.multi_reduction <add>, %1, %cst [0] : vector<8x128xf32> to vector<128xf32>
    %3 = vector.shape_cast %2 : vector<128xf32> to vector<1x128xf32>
    %c0_2 = arith.constant 0 : index
    %c0_3 = arith.constant 0 : index
    %4 = vector.load %arg2[%c0_2, %c0_3] : memref<128x128xf32, #tpu.memory_space<vmem>>, vector<128x128xf32>
    %cst_4 = arith.constant dense<0.000000e+00> : vector<1x128xf32>
    %5 = tpu.matmul %3, %4, %cst_4 {dimension_numbers = #tpu.dot_dimension_numbers<[1], [0], [0], [1], [0, 0, 1, 1], [], []>} : vector<1x128xf32>, vector<128x128xf32>, vector<1x128xf32> -> vector<1x128xf32>
    %c0_5 = arith.constant 0 : index
    %c0_6 = arith.constant 0 : index
    %6 = vector.load %arg3[%c0_5, %c0_6] : memref<1x128xf32, #tpu.memory_space<vmem>>, vector<1x128xf32>
    %7 = arith.addf %5, %6 : vector<1x128xf32>
    %8 = arith.negf %7 : vector<1x128xf32>
    %9 = math.exp %8 : vector<1x128xf32>
    %cst_7 = arith.constant 1.000000e+00 : f32
    %10 = vector.broadcast %cst_7 : f32 to vector<1x128xf32>
    %11 = arith.addf %10, %9 : vector<1x128xf32>
    %12 = arith.divf %10, %11 : vector<1x128xf32>
    %13 = vector.broadcast %12 : vector<1x128xf32> to vector<8x128xf32>
    %14 = arith.mulf %1, %13 : vector<8x128xf32>
    %c0_8 = arith.constant 0 : index
    %c0_9 = arith.constant 0 : index
    %c0_10 = arith.constant 0 : index
    %15 = vector.load %arg4[%c0_8, %c0_9, %c0_10] : memref<1x8x128xf32, #tpu.memory_space<vmem>>, vector<1x8x128xf32>
    %16 = vector.shape_cast %15 : vector<1x8x128xf32> to vector<8x128xf32>
    %17 = vector.shape_cast %14 : vector<8x128xf32> to vector<1x8x128xf32>
    tpu.vector_store %arg4[%c0_8, %c0_9, %c0_10], %17 {strides = array<i32>} : memref<1x8x128xf32, #tpu.memory_space<vmem>>, vector<1x8x128xf32>,
    return
  }
  func.func @transform_0(%arg0: i32) -> (i32, i32, i32) {
    %c0_i32 = arith.constant 0 : i32
    %c0_i32_0 = arith.constant 0 : i32
    %c0_i32_1 = arith.constant 0 : i32
    return %arg0, %c0_i32, %c0_i32_0 : i32, i32, i32
  }
  func.func @transform_1(%arg0: i32) -> (i32, i32) {
    %c0_i32 = arith.constant 0 : i32
    %c0_i32_0 = arith.constant 0 : i32
    %c0_i32_1 = arith.constant 0 : i32
    return %c0_i32, %c0_i32_0 : i32, i32
  }
  func.func @transform_2(%arg0: i32) -> (i32, i32) {
    %c0_i32 = arith.constant 0 : i32
    %c0_i32_0 = arith.constant 0 : i32
    %c0_i32_1 = arith.constant 0 : i32
    return %c0_i32, %c0_i32_0 : i32, i32
  }
  func.func @transform_3(%arg0: i32) -> (i32, i32, i32) {
    %c0_i32 = arith.constant 0 : i32
    %c0_i32_0 = arith.constant 0 : i32
    %c0_i32_1 = arith.constant 0 : i32
    return %arg0, %c0_i32, %c0_i32_0 : i32, i32, i32
  }
}

</mosaic_0001>

<bundles_post_ra>
// kernel: tpu_custom_call.1
= control target key start
LH: loop header
LB: loop body
LE: loop exit
PB: predicated region body
PF: predicated region fallthrough
CT: control target
= control target key end

     0   :  { %8 = vsyncpa [#allocation3], 0  ;;  %s919_s0 = inlined_call_operand.hbm [shape: f32[2,8,128], index: 0, kind: input, shape index: {}]   ;;  %s920_s1 = inlined_call_operand.hbm [shape: f32[128,128], index: 1, kind: input, shape index: {}]   ;;  %s921_s2 = inlined_call_operand.vmem [shape: f32[1,128], index: 2, kind: input, shape index: {}]   ;;  %s922_s3 = inlined_call_operand.hbm [shape: f32[2,8,128], index: 3, kind: output, shape index: {}]  }
   0x1   :  { %10 = vsyncpa [#allocation3 + $0x1], 0 }
   0x2   :  { %11 = vsyncpa [#allocation6], 0 }
   0x3   :  { %12 = vsyncpa [#allocation4], 0 }
   0x4   :  { %14 = vsyncpa [#allocation4 + $0x1], 0  ;;  %s716_s12 = smov 0   ;;  %s718_s13 = smov 0  }
   0x5   :  { %s720_s14 = smov 0   ;;  %s722_s15 = smov 0  }
   0x6 LB: > { %s737_s16 = sadd.s32 4294967295, %s686_s15   ;;  %s401_s17 = sadd.s32 4294967294, %s686_s15   ;;  %s686_s15 = sphi %s722_s15, %s942_s15   ;;  %s682_s14 = sphi %s720_s14, %s941_s14   ;;  %s678_s13 = sphi %s718_s13, %s940_s13   ;;  %s674_s12 = sphi %s716_s12, %s939_s12  }
   0x7   : > { %p40_p0 = scmp.ne.s32.totalorder %s678_s13, %s674_s12  ;;  %p923_p1 = scmp.eq.s32.totalorder %s737_s16, 0 }
   0x8   : > { %p112_p3 = scmp.eq.s32.totalorder %s401_s17, 1  ;;  %p402_p5 = scmp.ge.s32.totalorder %s686_s15, 1 }
   0x9   : > { %p746_p4 = por %p923_p1, %p40_p0  ;;  %p119_p7 = scmp.lt.s32.totalorder %s686_s15, 3 }
   0xa   : > { %p751_p6 = por %p112_p3, %p40_p0  ;;  %s688_s21 = smov [#allocation5]  }
   0xb   : > { %s926_s18 = scalar_select %p746_p4, 1, 0 }
   0xc   : > { %s927_s19 = scalar_select %p751_p6, 1, 0 }
   0xd   : > { %p756_p8 = pnand %p402_p5, %p119_p7  ;;  %s131_s22 = sshll.u32 %s688_s21, 4  ;;  %s760_s22 = int_to_ptr.vmem [resolvable:$true] %s131_s22 }
   0xe   : > { %s772_s24 = sadd.s32 1, %s686_s15   ;;  %s27_s25 = sadd.s32 1, %s682_s14 }
   0xf   : > { %s928_s20 = scalar_select %p756_p8, 1, 0 }
  0x10   : > { %p500_p9 = pneg %p756_p8  ;;  %s24_s26 = ssub.s32 %s686_s15, %s772_s24 }
  0x11   : > { %s558_s29 = scalar_lea.hbm %s920_s1, 2048 }
  0x12   : > { %p767_p11 = pnand %p500_p9, %p923_p1  ;;  %p559_p12 = scmp.ne.s32.totalorder %s920_s1, %s558_s29 }
  0x13   : > { %p565_p5 = scmp.lt.u32.totalorder %s558_s29, %s920_s1 }
  0x14   : > { %p560_p13 = pneg %p767_p11 }
  0x16   : > { %p561_p0 = pnand %p560_p13, %p559_p12 }
  0x18   : > { %p562_p3 = pneg %p561_p0 }
  0x1a   : > { %p567_p7 = pnand %p565_p5, %p562_p3 }
  0x1c   : > { %570 = shalt.err (!%p567_p7)
}
  0x1d   : > { %s571_s7 = scalar_lea.vmem %s760_s22, 2048  ;;  %p579_p2 = scmp.lt.s32.totalorder %s760_s22, %s760_s22 }
  0x1e   : > { %p572_p9 = scmp.ne.s32.totalorder %s760_s22, %s571_s7  ;;  %p580_p6 = scmp.lt.s32.totalorder %s571_s7, %s571_s7 }
  0x20   : > { %p574_p10 = pnand %p572_p9, %p560_p13  ;;  %p581_p4 = por %p580_p6, %p579_p2 }
  0x22   : > { %p575_p1 = pneg %p574_p10 }
  0x24   : > { %p582_p8 = pnand %p581_p4, %p575_p1 }
  0x26   : > { %585 = shalt.err (!%p582_p8)
}
  0x27   : > { %s689_s8 = smov 128   ;;  %s690_s9 = smov 8  }
  0x28   : > { %503 = dma.hbm_to_vmem [thread:$0]  (!%p767_p11), %s920_s1, 2048, %s760_s22, [#allocation6], %s689_s8, %s689_s8, %s690_s9  }
  0x29   : > { %p25_p2 = scmp.eq.s32.totalorder %s24_s26, 0  ;;  %p34_p1 = scmp.ne.s32.totalorder %s682_s14, %s678_s13 }
  0x2a   : > { %p35_p4 = scmp.eq.s32.totalorder %s686_s15, 0  ;;  %p513_p6 = scmp.lt.s32.totalorder %s686_s15, 2 }
  0x2b   : > { %s803_s17 = scalar_select %p25_p2, %s682_s14, %s27_s25  }
  0x2c   : > { %p36_p8 = por %p35_p4, %p34_p1  ;;  %p930_p10 = scmp.eq.s32.totalorder %s737_s16, 1 }
  0x2d   : > { %s148_s27 = sand.u32 1, %s682_s14   ;;  %s406_s28 = sshll.u32 %s686_s15, 7 }
  0x2e   : > { %p807_p12 = por %p930_p10, %p34_p1  ;;  %s405_s29 = sshll.u32 %s148_s27, 3 }
  0x2f   : > { %s816_s4 = scalar_lea.hbm %s919_s0, %s406_s28  ;;  %s152_s22 = scalar_lea.vmem [#allocation2], %s405_s29 }
  0x30   : > { %s159_s25 = sshll.u32 %s152_s22, 4  ;;  %p818_p11 = pnand %p513_p6, %p36_p8  ;;  %s822_s25 = int_to_ptr.vmem [resolvable:$true] %s159_s25 }
  0x31   : > { %s149_s5 = scalar_lea.sflag [#allocation3], %s148_s27  ;;  %s586_s6 = scalar_lea.hbm %s816_s4, 128 }
  0x32   : > { %p587_p13 = scmp.ne.s32.totalorder %s816_s4, %s586_s6  ;;  %p588_p0 = pneg %p818_p11 }
  0x33   : > { %s591_s9 = scalar_lea.hbm %s919_s0, 256  ;;  %p592_p7 = scmp.lt.u32.totalorder %s816_s4, %s919_s0 }
  0x34   : > { %p589_p3 = pnand %p588_p0, %p587_p13  ;;  %p593_p9 = scmp.lt.u32.totalorder %s591_s9, %s586_s6 }
  0x35   : > { %p595_p1 = scmp.lt.u32.totalorder %s586_s6, %s816_s4 }
  0x36   : > { %p590_p5 = pneg %p589_p3  ;;  %p594_p2 = por %p593_p9, %p592_p7 }
  0x38   : > { %p596_p4 = por %p595_p1, %p594_p2 }
  0x3a   : > { %p597_p6 = pnand %p596_p4, %p590_p5 }
  0x3c   : > { %600 = shalt.err (!%p597_p6)
}
  0x3d   : > { %s601_s27 = scalar_lea.vmem %s822_s25, 128  ;;  %s691_s28 = smov [#allocation2]  }
  0x3e   : > { %p602_p8 = scmp.ne.s32.totalorder %s822_s25, %s601_s27  ;;  %s606_s29 = sshll.u32 %s691_s28, 4  ;;  %s607_s29 = int_to_ptr.vmem [resolvable:$false] %s606_s29 }
  0x3f   : > { %s608_s23 = scalar_lea.vmem %s607_s29, 256  ;;  %p609_p3 = scmp.lt.s32.totalorder %s822_s25, %s607_s29 }
  0x40   : > { %p604_p10 = pnand %p602_p8, %p588_p0  ;;  %p610_p7 = scmp.lt.s32.totalorder %s608_s23, %s601_s27 }
  0x42   : > { %p605_p13 = pneg %p604_p10  ;;  %p611_p9 = por %p610_p7, %p609_p3 }
  0x44   : > { %p612_p2 = pnand %p611_p9, %p605_p13 }
  0x46   : > { %615 = shalt.err (!%p612_p2)
}
  0x47   : > { %507 = dma.hbm_to_vmem [thread:$0]  (!%p818_p11), %s816_s4, 128, %s822_s25, %s149_s5  }
  0x48   : > { %p933_p5 = scmp.ne.s32.totalorder %s928_s20, 0 }
  0x49   : > { %s852_s30 = sand.u32 (!%p933_p5), 1, %s678_s13   ;;  %p934_p0 = scmp.ne.s32.totalorder (!%p933_p5), %s926_s18, 0 }
  0x4a   : > { %168 = sbr.rel (%p933_p5) target bundleno = 377 (0x179), region = 32  ;;  %s408_s22 = sshll.u32 (!%p933_p5), %s852_s30, 3 }
  0x4b   : > { %s171_s6 = scalar_lea.sflag (!%p933_p5), [#allocation3], %s852_s30  ;;  %s174_s7 = scalar_lea.vmem (!%p933_p5), [#allocation2], %s408_s22 }
  0x51   : > { %661 = dma.done.wait (%p934_p0), %s171_s6, 128  }
  0x52   : > { %663 = vsyncadd (%p934_p0), %s171_s6, 4294967168  ;;  %p935_p11 = scmp.eq.s32.totalorder %s737_s16, 0 }
  0x54   : > { %665 = dma.done.wait (%p935_p11), [#allocation6], 2048   ;;  %p936_p1 = pmov %p935_p11 }
  0x55   : > { %v692_v0 = vmov 0.0|0.0   ;;  %vm693_vm0 = vmmov 0   ;;  %v694_v1 = vmov 0.0   ;;  %v208_v2 = vld [vmem:[#allocation5] sm:$0xff]  ;;  %v209_v3 = vld [vmem:[#allocation5 + $0x8] sm:$0xff]  ;;  %v210_v4 = vld [vmem:[#allocation5 + $0x10] sm:$0xff]  ;;  %v301_v40 = vlaneseq }
  0x56   : > { %667 = vsyncadd (%p936_p1), [#allocation6], 4294965248  ;;  %468 = vmatprep.subr.bf16.mxu0 %v692_v0  ;;  %465 = vmatprep.mubr.msk.f32.mxu0 %vm693_vm0, %v694_v1  ;;  %v469_v5 = vpack.c.bf16 %v209_v3, %v208_v2  ;;  %v211_v6 = vld [vmem:[#allocation5 + $0x18] sm:$0xff]  ;;  %v212_v8 = vld [vmem:[#allocation5 + $0x20] sm:$0xff]  ;;  %s413_s4 = sshll.u32 %s737_s16, 7  ;;  %s200_s25 = scalar_lea.vmem [#allocation7], %s408_s22 }
  0x57   : > { %v472_v7 = vpack.c.bf16 %v211_v6, %v210_v4  ;;  %v213_v9 = vld [vmem:[#allocation5 + $0x28] sm:$0xff]  ;;  %v201_v11 = vld [vmem:[%s174_s7] sm:$0xff]  ;;  %v216_v16 = vld [vmem:[#allocation5 + $0x40] sm:$0xff]  ;;  %v302_v41 = vshrl.u32 %v301_v40, 7  ;;  %s321_s26 = sshll.u32 %s200_s25, 4  ;;  %s875_s9 = scalar_lea.hbm %s922_s3, %s413_s4  ;;  %s877_s26 = int_to_ptr.vmem [resolvable:$true] %s321_s26 }
  0x58   : > { %470 = vmatpush3.bf16.msra.mxu0 %v469_v5  ;;  %v475_v10 = vpack.c.bf16 %v213_v9, %v212_v8  ;;  %v214_v12 = vld [vmem:[#allocation5 + $0x30] sm:$0xff]  ;;  %v215_v13 = vld [vmem:[#allocation5 + $0x38] sm:$0xff]  ;;  %v202_v14 = vrot.slane %v201_v11, 4  ;;  %v217_v17 = vld [vmem:[#allocation5 + $0x48] sm:$0xff]  ;;  %s308_s10 = scalar_lea.sflag [#allocation4], %s852_s30  ;;  %s616_s11 = scalar_lea.vmem %s877_s26, 128 }
  0x59   : > { %471 = vmatprep.subr.bf16.mxu0 %v692_v0  ;;  %v478_v15 = vpack.c.bf16 %v215_v13, %v214_v12  ;;  %v481_v19 = vpack.c.bf16 %v217_v17, %v216_v16  ;;  %v218_v20 = vld [vmem:[#allocation5 + $0x50] sm:$0xff]  ;;  %v219_v21 = vld [vmem:[#allocation5 + $0x58] sm:$0xff]  ;;  %v220_v24 = vld [vmem:[#allocation5 + $0x60] sm:$0xff]  ;;  %v303_v42 = vsub.s32 0, %v302_v41  ;;  %p617_p4 = scmp.ne.s32.totalorder %s877_s26, %s616_s11  ;;  %s695_s16 = smov [#allocation7]  }
  0x5a   : > { %v203_v18 = vadd.f32 %v202_v14, %v201_v11  ;;  %v484_v23 = vpack.c.bf16 %v219_v21, %v218_v20  ;;  %v221_v25 = vld [vmem:[#allocation5 + $0x68] sm:$0xff]  ;;  %v222_v28 = vld [vmem:[#allocation5 + $0x70] sm:$0xff]  ;;  %v223_v29 = vld [vmem:[#allocation5 + $0x78] sm:$0xff]  ;;  %s620_s27 = sshll.u32 %s695_s16, 4  ;;  %s621_s27 = int_to_ptr.vmem [resolvable:$false] %s620_s27 }
  0x5b   : > { %v487_v27 = vpack.c.bf16 %v221_v25, %v220_v24  ;;  %v490_v31 = vpack.c.bf16 %v223_v29, %v222_v28  ;;  %v224_v33 = vld [vmem:[%s921_s2] sm:$0x1]  ;;  %p618_p6 = pnand %p617_p4, %p807_p12  ;;  %s622_s28 = scalar_lea.vmem %s621_s27, 256 }
  0x5c   : > { %473 = vmatpush3.bf16.msra.mxu0 %v472_v7  ;;  %v204_v22 = vrot.slane %v203_v18, 2  ;;  %p623_p10 = scmp.lt.s32.totalorder %s877_s26, %s621_s27  ;;  %p624_p13 = scmp.lt.s32.totalorder %s622_s28, %s616_s11 }
  0x5d   : > { %474 = vmatprep.subr.bf16.mxu0 %v692_v0  ;;  %p619_p8 = pneg %p618_p6 }
  0x5e   : > { %v205_v26 = vadd.f32 %v204_v22, %v203_v18  ;;  %p625_p3 = por %p624_p13, %p623_p10 }
  0x60   : > { %476 = vmatpush3.bf16.msra.mxu0 %v475_v10  ;;  %v206_v30 = vrot.slane %v205_v26, 1  ;;  %p626_p7 = pnand %p625_p3, %p619_p8 }
  0x61   : > { %477 = vmatprep.subr.bf16.mxu0 %v692_v0 }
  0x62   : > { %v207_v32 = vadd.f32 %v206_v30, %v205_v26 }
  0x64   : > { %479 = vmatpush3.bf16.msra.mxu0 %v478_v15 }
  0x65   : > { %480 = vmatprep.subr.bf16.mxu0 %v692_v0 }
  0x68   : > { %482 = vmatpush3.bf16.msra.mxu0 %v481_v19 }
  0x69   : > { %483 = vmatprep.subr.bf16.mxu0 %v692_v0 }
  0x6c   : > { %485 = vmatpush3.bf16.msra.mxu0 %v484_v23 }
  0x6d   : > { %486 = vmatprep.subr.bf16.mxu0 %v692_v0 }
  0x70   : > { %488 = vmatpush3.bf16.msra.mxu0 %v487_v27 }
  0x71   : > { %489 = vmatprep.subr.bf16.mxu0 %v692_v0 }
  0x74   : > { %491 = vmatpush3.bf16.msra.mxu0 %v490_v31 }
  0x77   : > { %466 = vmatmul.mubr.f32.vlgmr.msra.gmra.mrb[0].mxu0 %v207_v32 }
 0x14a   : > { %v291_v34 = vpop.f32.mrb[0].mxu0 }
 0x14b   : > { %v292_v35 = vadd.f32 %v291_v34, %v224_v33  ;;  %v467_v36 = vpop.f32.mrb[1].mxu0 }
 0x14d   : > { %v411_v37 = vmul.f32 -1.442695, %v292_v35 }
 0x14f   : > { %554 = vpow2.f32 %v411_v37 }
 0x159   : > { %v555_v38 = vpop.eup %554 }
 0x15a   : > { %v298_v39 = vadd.f32 1.0, %v555_v38 }
 0x15c   : > { %556 = vrcp.f32 %v298_v39 }
 0x166   : > { %v557_v43 = vpop.eup %556 }
 0x167   : > { %v304_v44 = vrot.slane %v557_v43, %v303_v42 }
 0x169   : > { %v305_v45 = vmul.f32 %v304_v44, %v201_v11 }
 0x16b   : > { %306 = vst [vmem:[%s200_s25] sm:$0xff] %v305_v45 }
 0x16c   : > { %629 = shalt.err (!%p626_p7)
}
 0x16d   : > { %s630_s29 = scalar_lea.hbm %s875_s9, 128  ;;  %s634_s22 = scalar_lea.hbm %s922_s3, 256 }
 0x16e   : > { %p631_p9 = scmp.ne.s32.totalorder %s875_s9, %s630_s29  ;;  %p635_p0 = scmp.lt.u32.totalorder %s875_s9, %s922_s3 }
 0x16f   : > { %p636_p11 = scmp.lt.u32.totalorder %s634_s22, %s630_s29  ;;  %p638_p4 = scmp.lt.u32.totalorder %s630_s29, %s875_s9 }
 0x170   : > { %p632_p2 = pnand %p631_p9, %p807_p12 }
 0x171   : > { %p637_p1 = por %p636_p11, %p635_p0 }
 0x172   : > { %p633_p5 = pneg %p632_p2 }
 0x173   : > { %p639_p6 = por %p638_p4, %p637_p1 }
 0x175   : > { %p640_p8 = pnand %p639_p6, %p633_p5 }
 0x177   : > { %643 = shalt.err (!%p640_p8)
}
 0x178   : > { %498 = dma.vmem_to_hbm [thread:$0]  (%p807_p12), %s877_s26, 128, %s875_s9, %s308_s10  }
 0x179 PF: > { %s333_s18 = sand.u32 1, %s674_s12   ;;  %p937_p10 = scmp.ne.s32.totalorder %s927_s19, 0 }
 0x17a   : > { %p938_p13 = scmp.ge.s32.totalorder %s686_s15, 2  ;;  %s334_s20 = scalar_lea.sflag [#allocation4], %s333_s18 }
 0x17c   : > { %p509_p3 = pnand %p938_p13, %p937_p10 }
 0x17e   : > { %669 = dma.done.wait (!%p509_p3), %s334_s20, 128  }
 0x17f   : > { %671 = vsyncadd (!%p509_p3), %s334_s20, 4294967168  ;;  %p17_p7 = scmp.ge.s32.totalorder %s772_s24, 4   ;;  %s939_s12 = smov %s678_s13 }
 0x180   : > { %s940_s13 = smov %s682_s14  ;;  %s941_s14 = smov %s803_s17 }
 0x181   : > { %s942_s15 = smov %s772_s24  ;;  %19 = sbr.rel (!%p17_p7) target bundleno = 6 (0x6), region = 81 }
 0x188   :  { %339 = vsyncpa [#allocation3], 1 }
 0x189   :  { %341 = vsyncpa [#allocation3 + $0x1], 1 }
 0x18a   :  { %342 = vsyncpa [#allocation6], 1 }
 0x18b   :  { %343 = vsyncpa [#allocation4], 1 }
 0x18c   :  { %345 = vsyncpa [#allocation4 + $0x1], 1 }

</bundles_post_ra>
